<compile_context>
chip_gen: v7x
topology: tpu7x:2x2x1
jax: 0.10.0
libtpu: 0.0.40
codegen_flags: <defaults>
</compile_context>

<pallas_src>
import math

import jax
import jax.numpy as jnp
from jax import lax
from jax.experimental import pallas as pl
from jax.experimental.pallas import tpu as pltpu


# ----------------------------------------------------------------------------
# Parameter preparation (module-__init__ analogue; runs once, not per forward)
# ----------------------------------------------------------------------------
def prepare_params(w, b, gamma, beta, *, matmul_dtype=jnp.bfloat16):
    """w: [Dout, Din] (nn.Linear layout); b/gamma/beta: [Dout].

    Returns:
      wt : [Din, Dout] matmul_dtype (transposed, unpadded)
      bgb: [8, Dout] float32, row0=bias, row1=gamma, row2=beta
           (one sublane-aligned tile -> a single DMA for all three vectors)
    """
    Dout, _ = w.shape
    wt = jnp.asarray(w, jnp.float32).T.astype(matmul_dtype)
    bgb = jnp.zeros((8, Dout), jnp.float32)
    bgb = bgb.at[0].set(jnp.asarray(b, jnp.float32))
    bgb = bgb.at[1].set(jnp.asarray(gamma, jnp.float32))
    bgb = bgb.at[2].set(jnp.asarray(beta, jnp.float32))
    return wt, bgb


# ----------------------------------------------------------------------------
# Helpers
# ----------------------------------------------------------------------------
def _pick_batch_tile(batch, target):
    """Largest 8-multiple divisor of `batch` that is <= target (else monolithic)."""
    if batch <= target:
        return batch
    for tb in range(min(target, batch), 7, -1):
        if batch % tb == 0 and tb % 8 == 0:
            return tb
    return batch


def _nbytes(shape, dtype):
    return math.prod(shape) * jnp.dtype(dtype).itemsize


def _compiler_params(est_bytes, dims=None):
    # Explicit VMEM limit derived from the footprint (scoped defaults are only
    # 16/32 MiB on v5e / v6e+v7x); clamped so we never shrink below the default.
    limit = min(max(est_bytes + est_bytes // 2 + (4 << 20), 32 << 20), 96 << 20)
    kwargs = dict(vmem_limit_bytes=int(limit))
    if dims is not None:
        kwargs["dimension_semantics"] = dims
    return pltpu.CompilerParams(**kwargs)


def _linear(x_ref, wt_ref, bgb, mm_dtype):
    # Cast x to the matmul operand dtype inside the kernel (VPU); MXU acc is f32.
    y = jnp.dot(x_ref[...].astype(mm_dtype), wt_ref[...],
                preferred_element_type=jnp.float32)
    return y + bgb[0:1, :]


def _relu_dropout(y, rand, dropout_rate):
    y = jnp.maximum(y, 0.0)
    if dropout_rate > 0.0:
        keep = rand >= jnp.float32(dropout_rate)           # P(keep) = 1 - p
        y = jnp.where(keep, y * jnp.float32(1.0 / (1.0 - dropout_rate)), 0.0)
    return y


# ----------------------------------------------------------------------------
# Kernel bodies
# ----------------------------------------------------------------------------
def _make_monolithic_kernel(batch_norm, dropout_rate, eps, n_rows, mm_dtype):
    """Whole batch resident in VMEM; single invocation, no grid."""
    use_dropout = dropout_rate > 0.0
    inv_n = 1.0 / float(n_rows)

    def kernel(*refs):
        if use_dropout:
            x_ref, wt_ref, bgb_ref, rand_ref, o_ref = refs
        else:
            x_ref, wt_ref, bgb_ref, o_ref = refs
        bgb = bgb_ref[...]
        y = _linear(x_ref, wt_ref, bgb, mm_dtype)
        if batch_norm:
            # One-sweep batch stats: biased variance = E[y^2] - E[y]^2.
            mean = jnp.sum(y, axis=0, keepdims=True) * inv_n
            var = jnp.maximum(
                jnp.sum(y * y, axis=0, keepdims=True) * inv_n - mean * mean, 0.0)
            a = bgb[1:2, :] * lax.rsqrt(var + eps)          # gamma / sqrt(var+eps)
            c = bgb[2:3, :] - mean * a                      # beta - mean * a
            y = y * a + c
        rand = rand_ref[...] if use_dropout else None
        o_ref[...] = _relu_dropout(y, rand, dropout_rate).astype(o_ref.dtype)

    return kernel


def _make_tiled_kernel(dropout_rate, mm_dtype):
    """batch_norm=False, batch tiled on a parallel grid axis."""
    use_dropout = dropout_rate > 0.0

    def kernel(*refs):
        if use_dropout:
            x_ref, wt_ref, bgb_ref, rand_ref, o_ref = refs
        else:
            x_ref, wt_ref, bgb_ref, o_ref = refs
        bgb = bgb_ref[...]
        y = _linear(x_ref, wt_ref, bgb, mm_dtype)
        rand = rand_ref[...] if use_dropout else None
        o_ref[...] = _relu_dropout(y, rand, dropout_rate).astype(o_ref.dtype)

    return kernel


def _make_tiled_bn_kernel(dropout_rate, eps, n_rows, mm_dtype):
    """batch_norm=True, batch tiled, two sequential phases over the tiles."""
    use_dropout = dropout_rate > 0.0
    inv_n = 1.0 / float(n_rows)

    def kernel(*refs):
        if use_dropout:
            x_ref, wt_ref, bgb_ref, rand_ref, o_ref, stats_ref = refs
        else:
            x_ref, wt_ref, bgb_ref, o_ref, stats_ref = refs
        phase = pl.program_id(0)
        bt = pl.program_id(1)
        bgb = bgb_ref[...]
        y = _linear(x_ref, wt_ref, bgb, mm_dtype)

        @pl.when(jnp.logical_and(phase == 0, bt == 0))
        def _():
            stats_ref[...] = jnp.zeros_like(stats_ref)

        @pl.when(phase == 0)
        def _():
            # Accumulate per-feature sum / sum-of-squares in one sweep.
            stats_ref[0:1, :] += jnp.sum(y, axis=0, keepdims=True)
            stats_ref[1:2, :] += jnp.sum(y * y, axis=0, keepdims=True)

        @pl.when(phase == 1)
        def _():
            mean = stats_ref[0:1, :] * inv_n
            var = jnp.maximum(stats_ref[1:2, :] * inv_n - mean * mean, 0.0)
            a = bgb[1:2, :] * lax.rsqrt(var + eps)
            c = bgb[2:3, :] - mean * a
            rand = rand_ref[...] if use_dropout else None
            z = _relu_dropout(y * a + c, rand, dropout_rate)
            o_ref[...] = z.astype(o_ref.dtype)

    return kernel


# ----------------------------------------------------------------------------
# Forward wrapper
# ----------------------------------------------------------------------------
def mlp_unit_forward(x, wt, bgb, *, batch_norm=True, dropout_rate=0.0,
                     dropout_key=None, eps=1e-5, out_dtype=None, block_b=512):
    """Pallas MlpUnitLayer.forward: Linear -> [BatchNorm1d] -> ReLU -> [Dropout].

    x  : [B, Din] activations (cast to wt.dtype inside the kernel)
    wt : [Din, Dout] from prepare_params (bf16 operands recommended on all gens)
    bgb: [8, Dout] float32 packed bias/gamma/beta from prepare_params
    out_dtype: output storage dtype (default float32; pass jnp.bfloat16 to halve
               the writeback when the next layer consumes bf16)
    block_b: rows per batch tile; B <= block_b runs the monolithic VMEM-resident
             path, larger B is tiled (mandatory for VMEM headroom on v7x).
    """
    B, Din = x.shape
    Din_w, Dout = wt.shape
    if Din_w != Din:
        raise ValueError(f"wt expects Din={Din_w}, x has Din={Din}")
    if not 0.0 <= dropout_rate < 1.0:
        raise ValueError("dropout_rate must be in [0, 1)")
    out_dtype = jnp.float32 if out_dtype is None else out_dtype
    dropout_rate = float(dropout_rate)
    use_dropout = dropout_rate > 0.0
    mm_dtype = wt.dtype

    inputs = [x, wt, bgb]
    if use_dropout:
        # TODO(synk): on TPU-only builds use pltpu.prng_seed/prng_random_bits
        # in-kernel instead of streaming this uniform tensor from HBM.
        if dropout_key is None:
            dropout_key = jax.random.PRNGKey(0)
        inputs.append(jax.random.uniform(dropout_key, (B, Dout), jnp.float32))

    out_shape = jax.ShapeDtypeStruct((B, Dout), out_dtype)
    tb = _pick_batch_tile(B, block_b)
    nbt = B // tb
    weight_bytes = _nbytes((Din, Dout), mm_dtype) + _nbytes((8, Dout), jnp.float32)

    if nbt == 1:
        # Monolithic: grid-less call, whole-array operands single-buffered in VMEM.
        est = (weight_bytes + _nbytes((B, Din), x.dtype)
               + _nbytes((B, Dout), out_dtype)
               + (_nbytes((B, Dout), jnp.float32) if use_dropout else 0))
        kernel = _make_monolithic_kernel(batch_norm, dropout_rate, eps, B, mm_dtype)
        return pl.pallas_call(
            kernel, out_shape=out_shape,
            compiler_params=_compiler_params(est),
        )(*inputs)

    # Batch-tiled: weights resident, activation tiles pipelined (double-buffered).
    est = (weight_bytes + _nbytes((8, Dout), jnp.float32)
           + 2 * (_nbytes((tb, Din), x.dtype) + _nbytes((tb, Dout), out_dtype))
           + (2 * _nbytes((tb, Dout), jnp.float32) if use_dropout else 0))

    if not batch_norm:
        in_specs = [
            pl.BlockSpec((tb, Din), lambda i: (i, 0)),
            pl.BlockSpec((Din, Dout), lambda i: (0, 0)),
            pl.BlockSpec((8, Dout), lambda i: (0, 0)),
        ]
        if use_dropout:
            in_specs.append(pl.BlockSpec((tb, Dout), lambda i: (i, 0)))
        return pl.pallas_call(
            _make_tiled_kernel(dropout_rate, mm_dtype),
            out_shape=out_shape,
            grid=(nbt,),
            in_specs=in_specs,
            out_specs=pl.BlockSpec((tb, Dout), lambda i: (i, 0)),
            compiler_params=_compiler_params(est, dims=("parallel",)),
        )(*inputs)

    # batch_norm=True with tiling: two sequential phases (exact full-batch stats).
    in_specs = [
        pl.BlockSpec((tb, Din), lambda p, i: (i, 0)),
        pl.BlockSpec((Din, Dout), lambda p, i: (0, 0)),
        pl.BlockSpec((8, Dout), lambda p, i: (0, 0)),
    ]
    if use_dropout:
        in_specs.append(pl.BlockSpec((tb, Dout), lambda p, i: (p * i, 0)))
    return pl.pallas_call(
        _make_tiled_bn_kernel(dropout_rate, eps, B, mm_dtype),
        out_shape=out_shape,
        grid=(2, nbt),
        in_specs=in_specs,
        out_specs=pl.BlockSpec((tb, Dout), lambda p, i: (p * i, 0)),
        scratch_shapes=[pltpu.VMEM((8, Dout), jnp.float32)],
        compiler_params=_compiler_params(est, dims=("arbitrary", "arbitrary")),
    )(*inputs)


# ----------------------------------------------------------------------------
# Pure-JAX reference + demo
# ----------------------------------------------------------------------------
def _reference(x, w, b, gamma, beta, batch_norm=True, eps=1e-5):
    y = x @ w.T + b
    if batch_norm:
        mean = jnp.mean(y, axis=0, keepdims=True)
        var = jnp.mean(jnp.square(y - mean), axis=0, keepdims=True)
        y = (y - mean) / jnp.sqrt(var + eps) * gamma + beta
    return jnp.maximum(y, 0.0)


if __name__ == "__main__":
    # Module config: input_dim=32, output_dim=32, batch_norm=True.
    B, Din, Dout = 8, 32, 32
    key = jax.random.PRNGKey(0)
    kx, kw, kd, kx2 = jax.random.split(key, 4)

    x = jax.random.normal(kx, (B, Din), dtype=jnp.float32)
    xavier_std = (2.0 / (Din + Dout)) ** 0.5               # xavier_normal_
    w = jax.random.normal(kw, (Dout, Din), dtype=jnp.float32) * xavier_std
    b = jnp.zeros((Dout,), jnp.float32)                    # zeros_ init
    gamma = jnp.ones((Dout,), jnp.float32)                 # fresh BatchNorm1d weight
    beta = jnp.zeros((Dout,), jnp.float32)                 # fresh BatchNorm1d bias

    ref = _reference(x, w, b, gamma, beta, batch_norm=True)

    # 1) Exact-semantics path: f32 matmul operands (torch fp32 parity).
    wt_f32, bgb = prepare_params(w, b, gamma, beta, matmul_dtype=jnp.float32)
    out_f32 = jax.block_until_ready(
        mlp_unit_forward(x, wt_f32, bgb, batch_norm=True))
    assert out_f32.shape == (B, Dout)
    assert jnp.allclose(out_f32, ref, atol=1e-4, rtol=1e-4), "f32 mismatch"

    # 2) Fast path (recommended on all generations): bf16 operands, f32 acc/BN.
    wt_bf16, _ = prepare_params(w, b, gamma, beta, matmul_dtype=jnp.bfloat16)
    out_bf16 = jax.block_until_ready(
        mlp_unit_forward(x, wt_bf16, bgb, batch_norm=True))
    assert jnp.allclose(out_bf16, ref, atol=5e-2, rtol=5e-2), "bf16 mismatch"

    # 3) Dropout p=0.5: every element is either 0 or 2x the no-dropout value.
    out_drop = jax.block_until_ready(
        mlp_unit_forward(x, wt_f32, bgb, batch_norm=True,
                         dropout_rate=0.5, dropout_key=kd))
    dropped = jnp.isclose(out_drop, 0.0, atol=1e-6)
    scaled = jnp.isclose(out_drop, 2.0 * out_f32, atol=1e-4, rtol=1e-4)
    assert bool(jnp.all(dropped | scaled)), "dropout mask/scale mismatch"

    # 4) Batch-tiled BN path (two-phase full-batch stats): B=32 in 8-row tiles.
    B2 = 32
    x2 = jax.random.normal(kx2, (B2, Din), dtype=jnp.float32)
    ref2 = _reference(x2, w, b, gamma, beta, batch_norm=True)
    out2 = jax.block_until_ready(
        mlp_unit_forward(x2, wt_f32, bgb, batch_norm=True, block_b=8))
    assert jnp.allclose(out2, ref2, atol=1e-4, rtol=1e-4), "tiled BN mismatch"

    # 5) Batch-tiled batch_norm=False path ("parallel" grid axis).
    ref3 = _reference(x2, w, b, gamma, beta, batch_norm=False)
    out3 = jax.block_until_ready(
        mlp_unit_forward(x2, wt_f32, bgb, batch_norm=False, block_b=8))
    assert jnp.allclose(out3, ref3, atol=1e-4, rtol=1e-4), "tiled no-BN mismatch"

    # TODO(synk): dropout uses jax.random (not torch's RNG stream), so the mask
    # matches torch.nn.Dropout only in distribution, not bitwise.
    print("KERNEL_OK")
</pallas_src>

<mosaic_0001>
module attributes {stable_mosaic.version = 11 : i64} {
  func.func @kernel(%arg0: memref<8x32xf32, #tpu.memory_space<vmem>>, %arg1: memref<32x32xf32, #tpu.memory_space<vmem>>, %arg2: memref<8x32xf32, #tpu.memory_space<vmem>>, %arg3: memref<8x32xf32, #tpu.memory_space<vmem>>) attributes {dimension_semantics = [], scalar_prefetch = 0 : i64, scratch_operands = 0 : i64, tpu.core_type = #tpu.core_type<tc>} {
    %c0 = arith.constant 0 : index
    %c0_0 = arith.constant 0 : index
    %0 = vector.load %arg2[%c0, %c0_0] : memref<8x32xf32, #tpu.memory_space<vmem>>, vector<8x32xf32>
    %c0_1 = arith.constant 0 : index
    %c0_2 = arith.constant 0 : index
    %1 = vector.load %arg0[%c0_1, %c0_2] : memref<8x32xf32, #tpu.memory_space<vmem>>, vector<8x32xf32>
    %c0_3 = arith.constant 0 : index
    %c0_4 = arith.constant 0 : index
    %2 = vector.load %arg1[%c0_3, %c0_4] : memref<32x32xf32, #tpu.memory_space<vmem>>, vector<32x32xf32>
    %cst = arith.constant dense<0.000000e+00> : vector<8x32xf32>
    %3 = tpu.matmul %1, %2, %cst {dimension_numbers = #tpu.dot_dimension_numbers<[1], [0], [0], [1], [0, 0, 1, 1], [], []>} : vector<8x32xf32>, vector<32x32xf32>, vector<8x32xf32> -> vector<8x32xf32>
    %4 = vector.extract_strided_slice %0 {offsets = [0, 0], sizes = [1, 32], strides = [1, 1]} : vector<8x32xf32> to vector<1x32xf32>
    %5 = vector.broadcast %4 : vector<1x32xf32> to vector<8x32xf32>
    %6 = arith.addf %3, %5 : vector<8x32xf32>
    %cst_5 = arith.constant dense<0.000000e+00> : vector<32xf32>
    %7 = vector.multi_reduction <add>, %6, %cst_5 [0] : vector<8x32xf32> to vector<32xf32>
    %8 = vector.shape_cast %7 : vector<32xf32> to vector<1x32xf32>
    %cst_6 = arith.constant 1.250000e-01 : f32
    %9 = vector.broadcast %cst_6 : f32 to vector<1x32xf32>
    %10 = arith.mulf %8, %9 : vector<1x32xf32>
    %11 = arith.mulf %6, %6 : vector<8x32xf32>
    %cst_7 = arith.constant dense<0.000000e+00> : vector<32xf32>
    %12 = vector.multi_reduction <add>, %11, %cst_7 [0] : vector<8x32xf32> to vector<32xf32>
    %13 = vector.shape_cast %12 : vector<32xf32> to vector<1x32xf32>
    %cst_8 = arith.constant 1.250000e-01 : f32
    %14 = vector.broadcast %cst_8 : f32 to vector<1x32xf32>
    %15 = arith.mulf %13, %14 : vector<1x32xf32>
    %16 = arith.mulf %10, %10 : vector<1x32xf32>
    %17 = arith.subf %15, %16 : vector<1x32xf32>
    %cst_9 = arith.constant 0.000000e+00 : f32
    %18 = vector.broadcast %cst_9 : f32 to vector<1x32xf32>
    %19 = arith.maximumf %17, %18 : vector<1x32xf32>
    %20 = vector.extract_strided_slice %0 {offsets = [1, 0], sizes = [1, 32], strides = [1, 1]} : vector<8x32xf32> to vector<1x32xf32>
    %cst_10 = arith.constant 9.99999974E-6 : f32
    %21 = vector.broadcast %cst_10 : f32 to vector<1x32xf32>
    %22 = arith.addf %19, %21 : vector<1x32xf32>
    %23 = math.rsqrt %22 : vector<1x32xf32>
    %24 = arith.mulf %20, %23 : vector<1x32xf32>
    %25 = vector.extract_strided_slice %0 {offsets = [2, 0], sizes = [1, 32], strides = [1, 1]} : vector<8x32xf32> to vector<1x32xf32>
    %26 = arith.mulf %10, %24 : vector<1x32xf32>
    %27 = arith.subf %25, %26 : vector<1x32xf32>
    %28 = vector.broadcast %24 : vector<1x32xf32> to vector<8x32xf32>
    %29 = arith.mulf %6, %28 : vector<8x32xf32>
    %30 = vector.broadcast %27 : vector<1x32xf32> to vector<8x32xf32>
    %31 = arith.addf %29, %30 : vector<8x32xf32>
    %cst_11 = arith.constant 0.000000e+00 : f32
    %32 = vector.broadcast %cst_11 : f32 to vector<8x32xf32>
    %33 = arith.maximumf %31, %32 : vector<8x32xf32>
    %c0_12 = arith.constant 0 : index
    %c0_13 = arith.constant 0 : index
    %34 = vector.load %arg3[%c0_12, %c0_13] : memref<8x32xf32, #tpu.memory_space<vmem>>, vector<8x32xf32>
    tpu.vector_store %arg3[%c0_12, %c0_13], %33 {strides = array<i32>} : memref<8x32xf32, #tpu.memory_space<vmem>>, vector<8x32xf32>,
    return
  }
}

</mosaic_0001>

<bundles_post_ra>
// kernel: tpu_custom_call.1
= control target key start
LH: loop header
LB: loop body
LE: loop exit
PB: predicated region body
PF: predicated region fallthrough
CT: control target
= control target key end

     0   :  { %8 = vsyncpa [#allocation3], 0  ;;  %s401_s0 = inlined_call_operand.hbm [shape: f32[8,32], index: 0, kind: input, shape index: {}]   ;;  %s402_s1 = inlined_call_operand.hbm [shape: f32[32,32], index: 1, kind: input, shape index: {}]   ;;  %s403_s2 = inlined_call_operand.hbm [shape: f32[8,32], index: 2, kind: input, shape index: {}]   ;;  %s404_s3 = inlined_call_operand.hbm [shape: f32[8,32], index: 3, kind: output, shape index: {}]  }
   0x1   :  { %9 = vsyncpa [#allocation6], 0 }
   0x2   :  { %10 = vsyncpa [#allocation4], 0  ;;  %s320_s12 = smov [#allocation5]   ;;  %s226_s16 = scalar_lea.hbm %s402_s1, 512 }
   0x3   :  { %s26_s13 = sshll.u32 %s320_s12, 4  ;;  %p227_p0 = scmp.ne.s32.totalorder %s402_s1, %s226_s16  ;;  %s27_s13 = int_to_ptr.vmem [resolvable:$true] %s26_s13 }
   0x4   :  { %p230_p1 = scmp.lt.u32.totalorder %s226_s16, %s402_s1 }
   0x6   :  { %p232_p2 = pnand %p230_p1, %p227_p0 }
   0x8   :  { %235 = shalt.err (!%p232_p2)
}
   0x9   :  { %s236_s21 = scalar_lea.vmem %s27_s13, 512  ;;  %p241_p4 = scmp.lt.s32.totalorder %s27_s13, %s27_s13 }
   0xa   :  { %p237_p3 = scmp.ne.s32.totalorder %s27_s13, %s236_s21  ;;  %p242_p5 = scmp.lt.s32.totalorder %s236_s21, %s236_s21 }
   0xc   :  { %p243_p6 = por %p242_p5, %p241_p4 }
   0xe   :  { %p244_p7 = pnand %p243_p6, %p237_p3 }
  0x10   :  { %247 = shalt.err (!%p244_p7)
}
  0x11   :  { %s321_s22 = smov 128   ;;  %s322_s23 = smov 8  }
  0x12   :  { %32 = dma.hbm_to_vmem [thread:$0]  %s402_s1, 512, %s27_s13, [#allocation6], %s321_s22, %s321_s22, %s322_s23  }
  0x13   :  { %s323_s26 = smov [#allocation2]   ;;  %s324_s28 = smov [#allocation7]  }
  0x14   :  { %s17_s27 = sshll.u32 %s323_s26, 4  ;;  %s39_s29 = sshll.u32 %s324_s28, 4  ;;  %s18_s27 = int_to_ptr.vmem [resolvable:$true] %s17_s27  ;;  %s40_s29 = int_to_ptr.vmem [resolvable:$true] %s39_s29 }
  0x15   :  { %s248_s5 = scalar_lea.hbm %s401_s0, 128 }
  0x16   :  { %p249_p8 = scmp.ne.s32.totalorder %s401_s0, %s248_s5  ;;  %p252_p9 = scmp.lt.u32.totalorder %s248_s5, %s401_s0 }
  0x18   :  { %p254_p10 = pnand %p252_p9, %p249_p8 }
  0x1a   :  { %257 = shalt.err (!%p254_p10)
}
  0x1b   :  { %s258_s1 = scalar_lea.vmem %s18_s27, 128  ;;  %p263_p12 = scmp.lt.s32.totalorder %s18_s27, %s18_s27 }
  0x1c   :  { %p259_p11 = scmp.ne.s32.totalorder %s18_s27, %s258_s1  ;;  %p264_p13 = scmp.lt.s32.totalorder %s258_s1, %s258_s1 }
  0x1e   :  { %p265_p0 = por %p264_p13, %p263_p12 }
  0x20   :  { %p266_p1 = pnand %p265_p0, %p259_p11 }
  0x22   :  { %269 = shalt.err (!%p266_p1)
}
  0x23   :  { %20 = dma.hbm_to_vmem [thread:$0]  %s401_s0, 128, %s18_s27, [#allocation3]  }
  0x24   :  { %s270_s14 = scalar_lea.hbm %s403_s2, 128 }
  0x25   :  { %p271_p2 = scmp.ne.s32.totalorder %s403_s2, %s270_s14  ;;  %p274_p3 = scmp.lt.u32.totalorder %s270_s14, %s403_s2 }
  0x27   :  { %p276_p4 = pnand %p274_p3, %p271_p2 }
  0x29   :  { %279 = shalt.err (!%p276_p4)
}
  0x2a   :  { %s280_s19 = scalar_lea.vmem %s40_s29, 128  ;;  %p285_p6 = scmp.lt.s32.totalorder %s40_s29, %s40_s29 }
  0x2b   :  { %p281_p5 = scmp.ne.s32.totalorder %s40_s29, %s280_s19  ;;  %p286_p7 = scmp.lt.s32.totalorder %s280_s19, %s280_s19 }
  0x2d   :  { %p287_p8 = por %p286_p7, %p285_p6 }
  0x2f   :  { %p288_p9 = pnand %p287_p8, %p281_p5 }
  0x31   :  { %291 = shalt.err (!%p288_p9)
}
  0x32   :  { %42 = dma.hbm_to_vmem [thread:$0]  %s403_s2, 128, %s40_s29, [#allocation6]  }
  0x33   :  { %314 = dma.done.wait [#allocation3], 128  }
  0x34   :  { %315 = vsyncadd [#allocation3], 4294967168 }
  0x35   :  { %316 = dma.done.wait [#allocation6], 640  }
  0x36   :  { %317 = vsyncadd [#allocation6], 4294966656  ;;  %v325_v0 = vmov 0.0|0.0   ;;  %vm326_vm0 = vmmov 0   ;;  %v327_v1 = vmov 0.0   ;;  %v54_v2 = vld [vmem:[#allocation5] sm:$0xff]  ;;  %v58_v9 = vlaneseq }
  0x37   :  { %209 = vmatprep.subr.bf16.mxu0 %v325_v0  ;;  %206 = vmatprep.mubr.msk.f32.mxu0 %vm326_vm0, %v327_v1  ;;  %v55_v3 = vld [vmem:[#allocation5 + $0x8] sm:$0xff]  ;;  %v56_v4 = vld [vmem:[#allocation5 + $0x10] sm:$0xff]  ;;  %v57_v6 = vld [vmem:[#allocation5 + $0x18] sm:$0xff]  ;;  %vm62_vm1 = vcmask 261120   ;;  %s328_s2 = smov [#allocation8]  }
  0x38   :  { %v210_v5 = vpack.c.bf16 %v55_v3, %v54_v2  ;;  %v213_v7 = vpack.c.bf16 %v57_v6, %v56_v4  ;;  %v53_v8 = vld [vmem:[#allocation2] sm:$0xff]  ;;  %v59_v10 = vshrl.u32 %v58_v9, 7  ;;  %v52_v12 = vld [vmem:[#allocation7] sm:$0xff]  ;;  %s182_s21 = sshll.u32 %s328_s2, 4  ;;  %s183_s21 = int_to_ptr.vmem [resolvable:$true] %s182_s21 }
  0x39   :  { %s292_s22 = scalar_lea.vmem %s183_s21, 128  ;;  %p297_p11 = scmp.lt.s32.totalorder %s183_s21, %s183_s21 }
  0x3a   :  { %211 = vmatpush3.bf16.msra.mxu0 %v210_v5  ;;  %v60_v11 = vsub.s32 0, %v59_v10  ;;  %v166_v40 = vsub.s32 1, %v59_v10  ;;  %v171_v44 = vsub.s32 2, %v59_v10  ;;  %p293_p10 = scmp.ne.s32.totalorder %s183_s21, %s292_s22  ;;  %p298_p12 = scmp.lt.s32.totalorder %s292_s22, %s292_s22 }
  0x3b   :  { %212 = vmatprep.subr.bf16.mxu0 %v325_v0 }
  0x3c   :  { %v61_v13 = vrot.slane %v52_v12, %v60_v11  ;;  %p299_p13 = por %p298_p12, %p297_p11 }
  0x3e   :  { %214 = vmatpush3.bf16.msra.mxu0 %v213_v7  ;;  %p300_p0 = pnand %p299_p13, %p293_p10 }
  0x41   :  { %207 = vmatmul.mubr.msk.f32.vlgmr.msra.gmra.mrb[0].mxu0 %vm62_vm1, %v53_v8 }
 0x114   :  { %v132_v14 = vpop.f32.mrb[0].mxu0 }
 0x115   :  { %v133_v15 = vadd.f32 %v132_v14, %v61_v13  ;;  %v208_v16 = vpop.f32.mrb[1].mxu0 }
 0x117   :  { %v136_v17 = vsel %vm62_vm1, %v133_v15, 0.0  ;;  %v144_v18 = vmul.f32 %v133_v15, %v133_v15 }
 0x118   :  { %v137_v19 = vrot.slane %v136_v17, 4 }
 0x119   :  { %v145_v20 = vsel %vm62_vm1, %v144_v18, 0.0 }
 0x11a   :  { %v138_v21 = vadd.f32 %v137_v19, %v136_v17  ;;  %v146_v22 = vrot.slane %v145_v20, 4 }
 0x11c   :  { %v139_v23 = vrot.slane %v138_v21, 2  ;;  %v147_v24 = vadd.f32 %v146_v22, %v145_v20 }
 0x11e   :  { %v140_v25 = vadd.f32 %v139_v23, %v138_v21  ;;  %v148_v26 = vrot.slane %v147_v24, 2 }
 0x120   :  { %v141_v27 = vrot.slane %v140_v25, 1  ;;  %v149_v28 = vadd.f32 %v148_v26, %v147_v24 }
 0x122   :  { %v142_v29 = vadd.f32 %v141_v27, %v140_v25  ;;  %v150_v30 = vrot.slane %v149_v28, 1 }
 0x124   :  { %v143_v31 = vmul.f32 0.125, %v142_v29  ;;  %v151_v32 = vadd.f32 %v150_v30, %v149_v28 }
 0x126   :  { %v152_v33 = vmul.f32 0.125, %v151_v32  ;;  %v153_v34 = vmul.f32 %v143_v31, %v143_v31 }
 0x128   :  { %v154_v35 = vsub.f32 %v152_v33, %v153_v34 }
 0x12a   :  { %v155_v36 = vmax.f32 %v154_v35, 0.0 }
 0x12c   :  { %v156_v37 = vadd.f32 1e-05, %v155_v36 }
 0x12e   :  { %224 = vrsqrt.f32 %v156_v37 }
 0x138   :  { %v225_v38 = vpop.eup %224 }
 0x139   :  { %v158_v39 = vmul.f32 %v225_v38, %v52_v12 }
 0x13b   :  { %v159_v41 = vmul.f32 %v158_v39, %v143_v31  ;;  %v167_v43 = vrot.slane %v158_v39, %v166_v40 }
 0x13d   :  { %v161_v42 = vrot.slane %v159_v41, 7  ;;  %v168_v46 = vmul.f32 %v167_v43, %v133_v15 }
 0x13f   :  { %v163_v45 = vsub.f32 %v52_v12, %v161_v42 }
 0x141   :  { %v172_v47 = vrot.slane %v163_v45, %v171_v44 }
 0x143   :  { %v173_v48 = vadd.f32 %v172_v47, %v168_v46 }
 0x145   :  { %v174_v49 = vmax.f32 %v173_v48, 0.0 }
 0x147   :  { %175 = vst.msk [vmem:[#allocation8] sm:$0xff] %vm62_vm1, %v174_v49 }
 0x148   :  { %303 = shalt.err (!%p300_p0)
}
 0x149   :  { %s304_s25 = scalar_lea.hbm %s404_s3, 128 }
 0x14a   :  { %p305_p1 = scmp.ne.s32.totalorder %s404_s3, %s304_s25  ;;  %p308_p2 = scmp.lt.u32.totalorder %s304_s25, %s404_s3 }
 0x14c   :  { %p310_p3 = pnand %p308_p2, %p305_p1 }
 0x14e   :  { %313 = shalt.err (!%p310_p3)
}
 0x14f   :  { %185 = dma.vmem_to_hbm [thread:$0]  %s183_s21, 128, %s404_s3, [#allocation4]  }
 0x150   :  { %318 = dma.done.wait [#allocation4], 128  }
 0x151   :  { %319 = vsyncadd [#allocation4], 4294967168 }
 0x152   :  { %189 = vsyncpa [#allocation3], 1 }
 0x153   :  { %190 = vsyncpa [#allocation6], 1 }
 0x154   :  { %191 = vsyncpa [#allocation4], 1 }

</bundles_post_ra>
